<compile_context>
chip_gen: v6e
topology: v6e:2x2x1
jax: 0.10.0
libtpu: 0.0.40
codegen_flags: <defaults>
</compile_context>

<pallas_src>
import functools

import jax
import jax.numpy as jnp
from jax.experimental import pallas as pl
from jax.experimental.pallas import tpu as pltpu


_VMEM_LIMIT_BYTES = 32 * 1024 * 1024  # safe on v5e/v6e (128 MiB phys) and v7x (64 MiB phys)


def _round_up(x, m):
    return ((x + m - 1) // m) * m


def _round_down(x, m):
    return (x // m) * m


def _pick_tile_n(n, d, itemsize):
    """VMEM-budgeted N tile for the streamed path.

    Keep the per-buffer DMA tile <= 4 MiB (<= 8 MiB double-buffered) and the in-kernel f32
    working copy <= 2 MiB, so the kernel fits comfortably inside the 32 MiB scoped limit on
    every generation (v7x has only 64 MiB physical VMEM).  At D=128 this lands tile_n at 4096.
    """
    cap_stream = max(8, (4 << 20) // max(1, d * itemsize))
    cap_f32 = max(8, (2 << 20) // max(1, d * 4))
    t = min(n, cap_stream, cap_f32, 4096)
    t = max(t, 8)
    if t < n:
        t = max(8, _round_down(t, 8))
    return t


# -----------------------------------------------------------------------------
# VectorsAttention -- resident path (small N): tile_b bags per grid step, one HBM read of v.
# -----------------------------------------------------------------------------
def _vectors_attention_resident_kernel(v_ref, w2_ref, wbm_ref, bias_ref, out_ref,
                                       *, at_type, out_pad):
    v = v_ref[...].astype(jnp.float32)                      # (tb, N, D), f32 accumulation
    w2 = w2_ref[...].astype(jnp.float32)                    # (D, 2): [:,0]=Wa, [:,1]=Wb[:, :D]
    ba = bias_ref[0:1, 0:1]                                 # (1, 1)
    bb = bias_ref[0:1, 1:2]                                 # (1, 1)

    # Both the alpha and the beta(v-part) logits in a single batched MXU pass: (tb, N, 2).
    logits = jnp.einsum("bnd,dk->bnk", v, w2, preferred_element_type=jnp.float32)

    alpha = jax.nn.sigmoid(logits[..., 0:1] + ba)           # (tb, N, 1)
    sum_av = jnp.einsum("bnk,bnd->bkd", alpha, v,
                        preferred_element_type=jnp.float32)[:, 0, :]     # (tb, D)
    sum_a = jnp.sum(alpha, axis=1)                          # (tb, 1)
    vm = sum_av / sum_a                                     # (tb, D)

    if at_type == "self":
        row = vm
    else:
        wbm = wbm_ref[...].astype(jnp.float32)              # (1, D) -- Wb[:, D:]
        # cat([v, vm]) @ Wb^T  ==  v @ Wb[:, :D]^T + vm . Wb[:, D:]   (no (N, 2D) concat needed)
        vm_term = jnp.sum(vm * wbm, axis=-1, keepdims=True)              # (tb, 1)
        beta = jax.nn.sigmoid(logits[..., 1:2] + vm_term[:, :, None] + bb)   # (tb, N, 1)
        sum_bv = jnp.einsum("bnk,bnd->bkd", beta, v,
                            preferred_element_type=jnp.float32)[:, 0, :]  # (tb, D)
        sum_b = jnp.sum(beta, axis=1)                       # (tb, 1)
        first = sum_bv / sum_b                              # (tb, D)
        # Second half of the relation output is exactly vm (Sum_n vm*beta_n / Sum_n beta_n == vm).
        row = jnp.concatenate([first, vm], axis=-1)         # (tb, 2D)

    width = row.shape[-1]
    if out_pad > width:                                     # lane-dense store
        row = jnp.concatenate(
            [row, jnp.zeros((row.shape[0], out_pad - width), jnp.float32)], axis=-1)
    out_ref[0] = row.astype(out_ref.dtype)


# -----------------------------------------------------------------------------
# VectorsAttention -- streamed path (large N): VMEM-budgeted N tiles, phases only for 'relation'.
# -----------------------------------------------------------------------------
def _vectors_attention_streamed_kernel(v_ref, w2_ref, wbm_ref, bias_ref, out_ref,
                                       acc_v, acc_w, vm_ref, bb_eff_ref,
                                       *, at_type, n_total, tile_n, out_pad):
    # grid = (batch, phase, n_tile); batch is "parallel", phase / n_tile are sequential.
    phase = pl.program_id(1)
    nt = pl.program_id(2)
    last_nt = pl.num_programs(2) - 1

    @pl.when(nt == 0)
    def _():
        acc_v[...] = jnp.zeros_like(acc_v)
        acc_w[...] = jnp.zeros_like(acc_w)

    v = v_ref[0].astype(jnp.float32)                        # (tile_n, D)

    # Mask rows past the true sequence length (only traced when N % tile_n != 0).
    if n_total % tile_n != 0:
        row = nt * tile_n + jax.lax.broadcasted_iota(jnp.int32, (tile_n, 1), 0)
        valid = row < n_total                               # (tile_n, 1)
        v = jnp.where(valid, v, 0.0)
    else:
        valid = None

    # Fused alpha / beta(v-part) logits in one MXU pass against the pre-transposed (D, 2) weight.
    logits = jnp.dot(v, w2_ref[...].astype(jnp.float32),
                     preferred_element_type=jnp.float32)    # (tile_n, 2)

    def _accumulate(weight):                                # weight: (tile_n, 1)
        if valid is not None:
            weight = jnp.where(valid, weight, 0.0)
        # Sum_n w_n * v_n as a transposed-LHS MXU matmul: (tile_n,1)^T @ (tile_n,D) -> (1,D).
        acc_v[...] += jnp.einsum("nk,nd->kd", weight, v, preferred_element_type=jnp.float32)
        acc_w[...] += jnp.sum(weight, axis=0, keepdims=True)          # (1, 1)

    def _final_row(pieces):
        width = sum(p.shape[-1] for p in pieces)
        if out_pad > width:                                 # lane-dense store
            pieces = list(pieces) + [jnp.zeros((1, out_pad - width), jnp.float32)]
        row = pieces[0] if len(pieces) == 1 else jnp.concatenate(pieces, axis=-1)
        return row.astype(out_ref.dtype)

    def _alpha_pass():
        _accumulate(jax.nn.sigmoid(logits[:, 0:1] + bias_ref[0:1, 0:1]))

        @pl.when(nt == last_nt)
        def _():
            vm = acc_v[...] / acc_w[...]                    # (1, D)
            if at_type == "relation":
                vm_ref[...] = vm
                # Hoist the per-tile beta constant:  vm . Wb[:, D:] + bb  (one scalar).
                bb_eff_ref[...] = (jnp.sum(vm * wbm_ref[...].astype(jnp.float32),
                                           axis=-1, keepdims=True)
                                   + bias_ref[0:1, 1:2])
            else:
                out_ref[0] = _final_row([vm])

    def _beta_pass():
        _accumulate(jax.nn.sigmoid(logits[:, 1:2] + bb_eff_ref[...]))

        @pl.when(nt == last_nt)
        def _():
            first = acc_v[...] / acc_w[...]                 # (1, D)
            out_ref[0] = _final_row([first, vm_ref[...]])   # second half == vm exactly

    if at_type == "relation":
        pl.when(phase == 0)(_alpha_pass)
        pl.when(phase == 1)(_beta_pass)
    else:
        _alpha_pass()


def vectors_attention(vector_s, wa, ba, wb, bb, *, at_type,
                      tile_n=None, tile_b=None, max_resident_bytes=2 << 20):
    """Batched VectorsAttention (eval mode).

    vector_s: (B, N, D) f32 or bf16; wa: (1, D); ba: (1,); wb: (1, 2D); bb: (1,).
    Returns (B, D) for at_type='self', (B, 2D) for at_type='relation'.
    Passing tile_n explicitly forces the streamed (N-tiled) path.
    """
    assert at_type in ("self", "relation")
    b, n, d = vector_s.shape
    out_dim = d if at_type == "self" else 2 * d
    out_pad = _round_up(out_dim, 128)

    # Fused / pre-transposed tiny Linear parameters (built once, outside the kernel).
    wa_r = wa.reshape(1, d).astype(jnp.float32)
    wb_r = wb.reshape(1, 2 * d).astype(jnp.float32)
    w2 = jnp.concatenate([wa_r, wb_r[:, :d]], axis=0).T      # (D, 2): [Wa | Wb[:, :D]]
    wbm = wb_r[:, d:]                                        # (1, D): Wb[:, D:]
    bias = jnp.concatenate([ba.reshape(1, 1), bb.reshape(1, 1)],
                           axis=1).astype(jnp.float32)       # (1, 2): [ba, bb]

    per_bag_f32 = n * d * 4
    use_resident = (tile_n is None) and (per_bag_f32 <= max_resident_bytes)

    if use_resident:
        # --- resident path: whole bag in VMEM, one HBM read of vector_s even for 'relation' ---
        if tile_b is None:
            tile_b = max(1, min(b, max_resident_bytes // per_bag_f32, 128))
        tile_b = max(1, min(tile_b, b))
        # Keep both v7x TensorCores busy when there are >= 2 bags (free elsewhere).
        if b >= 2 and pl.cdiv(b, tile_b) < 2:
            tile_b = (b + 1) // 2
        num_b_tiles = pl.cdiv(b, tile_b)
        b_pad = num_b_tiles * tile_b
        v_in = vector_s
        if b_pad != b:       # zero-pad the batch: padded bags stay finite and are sliced away
            v_in = jnp.concatenate(
                [vector_s, jnp.zeros((b_pad - b, n, d), vector_s.dtype)], axis=0)

        kernel = functools.partial(_vectors_attention_resident_kernel,
                                   at_type=at_type, out_pad=out_pad)
        out = pl.pallas_call(
            kernel,
            out_shape=jax.ShapeDtypeStruct((num_b_tiles, tile_b, out_pad), jnp.float32),
            grid_spec=pltpu.PrefetchScalarGridSpec(
                num_scalar_prefetch=0,
                grid=(num_b_tiles,),
                in_specs=[
                    pl.BlockSpec((tile_b, n, d), lambda i: (i, 0, 0)),   # tile_b bags
                    pl.BlockSpec((d, 2), lambda i: (0, 0)),              # fused [Wa | Wbv]
                    pl.BlockSpec((1, d), lambda i: (0, 0)),              # Wb[:, D:]
                    pl.BlockSpec((1, 2), lambda i: (0, 0)),              # [ba, bb]
                ],
                out_specs=pl.BlockSpec((1, tile_b, out_pad), lambda i: (i, 0, 0))),
            compiler_params=pltpu.CompilerParams(
                dimension_semantics=("parallel",),
                vmem_limit_bytes=_VMEM_LIMIT_BYTES),
        )(v_in, w2, wbm, bias)
        return out.reshape(b_pad, out_pad)[:b, :out_dim]

    # --- streamed path: large N, VMEM-budgeted tiles; relation mode streams v twice (phases) ---
    if tile_n is None:
        tile_n = _pick_tile_n(n, d, vector_s.dtype.itemsize)
    tile_n = min(tile_n, n)
    if tile_n != n:
        tile_n = max(8, _round_down(tile_n, 8))              # keep the sublane dim legal
    n_tiles = pl.cdiv(n, tile_n)
    n_phases = 1 if at_type == "self" else 2

    kernel = functools.partial(_vectors_attention_streamed_kernel, at_type=at_type,
                               n_total=n, tile_n=tile_n, out_pad=out_pad)
    out = pl.pallas_call(
        kernel,
        out_shape=jax.ShapeDtypeStruct((b, 1, out_pad), jnp.float32),
        grid_spec=pltpu.PrefetchScalarGridSpec(
            num_scalar_prefetch=0,
            grid=(b, n_phases, n_tiles),
            in_specs=[
                pl.BlockSpec((1, tile_n, d), lambda bi, p, ni: (bi, ni, 0)),  # vector_s tile
                pl.BlockSpec((d, 2), lambda bi, p, ni: (0, 0)),               # fused [Wa | Wbv]
                pl.BlockSpec((1, d), lambda bi, p, ni: (0, 0)),               # Wb[:, D:]
                pl.BlockSpec((1, 2), lambda bi, p, ni: (0, 0)),               # [ba, bb]
            ],
            out_specs=pl.BlockSpec((1, 1, out_pad), lambda bi, p, ni: (bi, 0, 0)),
            scratch_shapes=[
                pltpu.VMEM((1, d), jnp.float32),   # running Sum w*v
                pltpu.VMEM((1, 1), jnp.float32),   # running Sum w
                pltpu.VMEM((1, d), jnp.float32),   # vm carried from the alpha pass
                pltpu.VMEM((1, 1), jnp.float32),   # hoisted beta constant (vm.Wbm + bb)
            ]),
        compiler_params=pltpu.CompilerParams(
            dimension_semantics=("parallel", "arbitrary", "arbitrary"),
            vmem_limit_bytes=_VMEM_LIMIT_BYTES),
    )(vector_s, w2, wbm, bias)
    return out[:, 0, :out_dim]


# -----------------------------------------------------------------------------
# FullModal_VisualFeatureAttention.liner head: ReLU -> Dropout(0.6) -> Linear(D, num_class)
# -----------------------------------------------------------------------------
def _liner_head_kernel(x_ref, w_ref, b_ref, out_ref):
    # TODO(synk): nn.Dropout(0.6) is the identity in eval mode; train-mode stochastic dropout is
    # not reproduced in-kernel.
    x = jnp.maximum(x_ref[...].astype(jnp.float32), 0.0)                 # ReLU
    out_ref[...] = (jnp.dot(x, w_ref[...], preferred_element_type=jnp.float32)
                    + b_ref[...]).astype(out_ref.dtype)                  # lane-aligned store


def fullmodal_liner_head(feature_s, weight, bias, *, tile_b=256):
    """Pallas version of `self.liner` applied to the visual-encoder output.

    feature_s: (B, feature_dim); weight: (num_class, feature_dim) (torch layout); bias: (num_class,).
    Returns (B, num_class).
    """
    bsz, d = feature_s.shape
    num_class = weight.shape[0]
    out_pad = _round_up(num_class, 128)

    # Batch padded to a multiple of the (8-row-aligned) tile so no garbage rows enter the matmul.
    tile_b = max(8, _round_down(min(tile_b, _round_up(bsz, 8)), 8))
    b_pad = _round_up(bsz, tile_b)
    x = feature_s
    if b_pad != bsz:
        x = jnp.concatenate(
            [feature_s, jnp.zeros((b_pad - bsz, d), feature_s.dtype)], axis=0)

    # Lane-pad the tiny weight / bias once in the wrapper; the kernel writes unmasked 128-lane rows.
    w_t = jnp.zeros((d, out_pad), jnp.float32).at[:, :num_class].set(
        weight.T.astype(jnp.float32))
    b_r = jnp.zeros((1, out_pad), jnp.float32).at[:, :num_class].set(
        bias.reshape(1, num_class).astype(jnp.float32))

    out = pl.pallas_call(
        _liner_head_kernel,
        out_shape=jax.ShapeDtypeStruct((b_pad, out_pad), jnp.float32),
        grid_spec=pltpu.PrefetchScalarGridSpec(
            num_scalar_prefetch=0,
            grid=(b_pad // tile_b,),
            in_specs=[
                pl.BlockSpec((tile_b, d), lambda i: (i, 0)),
                pl.BlockSpec((d, out_pad), lambda i: (0, 0)),
                pl.BlockSpec((1, out_pad), lambda i: (0, 0)),
            ],
            out_specs=pl.BlockSpec((tile_b, out_pad), lambda i: (i, 0))),
        compiler_params=pltpu.CompilerParams(
            dimension_semantics=("parallel",),
            vmem_limit_bytes=_VMEM_LIMIT_BYTES),
    )(x, w_t, b_r)
    return out[:bsz, :num_class]


# -----------------------------------------------------------------------------
# Pure-JAX references (exact f32, elementwise -- no default-precision matmuls)
# -----------------------------------------------------------------------------
def vectors_attention_ref(vector_s, wa, ba, wb, bb, *, at_type):
    def one(v):
        v = v.astype(jnp.float32)
        alpha = jax.nn.sigmoid(jnp.sum(v * wa, axis=-1, keepdims=True) + ba)       # (N, 1)
        vm = jnp.sum(v * alpha, axis=0) / jnp.sum(alpha)                           # (D,)
        if at_type == "relation":
            cat = jnp.concatenate([v, jnp.broadcast_to(vm[None, :], v.shape)], axis=1)
            beta = jax.nn.sigmoid(jnp.sum(cat * wb, axis=-1, keepdims=True) + bb)  # (N, 1)
            vm = jnp.sum(cat * beta, axis=0) / jnp.sum(beta)                       # (2D,)
        return vm
    return jnp.stack([one(vector_s[i]) for i in range(vector_s.shape[0])])


def liner_head_ref(feature_s, weight, bias):
    x = jnp.maximum(feature_s.astype(jnp.float32), 0.0)
    return jnp.sum(x[:, None, :] * weight[None, :, :].astype(jnp.float32), axis=-1) + bias


def _check(name, out, ref, tol=1e-4):
    if not jnp.allclose(out, ref, atol=tol, rtol=tol):
        raise AssertionError(
            f"{name} mismatch: max abs err {float(jnp.max(jnp.abs(out - ref)))}")


if __name__ == "__main__":
    key = jax.random.PRNGKey(0)
    kx, kwa, kba, kwb, kbb, kx2, kf, kw, kb = jax.random.split(key, 9)

    # --- VectorsAttention, resident path: B=4 bags of N=32 frame vectors, D=128 ---
    B, N, D = 4, 32, 128
    vector_s = jax.random.normal(kx, (B, N, D), dtype=jnp.float32)
    wa = jax.random.normal(kwa, (1, D), dtype=jnp.float32) * 0.05
    ba = jax.random.normal(kba, (1,), dtype=jnp.float32) * 0.1
    wb = jax.random.normal(kwb, (1, 2 * D), dtype=jnp.float32) * 0.05
    bb = jax.random.normal(kbb, (1,), dtype=jnp.float32) * 0.1

    for at_type in ("self", "relation"):
        out = jax.block_until_ready(
            vectors_attention(vector_s, wa, ba, wb, bb, at_type=at_type))
        ref = vectors_attention_ref(vector_s, wa, ba, wb, bb, at_type=at_type)
        _check(f"VectorsAttention[resident,{at_type}]", out, ref)

    # bf16 activations (recommended default on v5e/v6e): kernel upcasts, f32 accumulation.
    v_bf16 = vector_s.astype(jnp.bfloat16)
    out = jax.block_until_ready(
        vectors_attention(v_bf16, wa, ba, wb, bb, at_type="relation"))
    ref = vectors_attention_ref(v_bf16.astype(jnp.float32), wa, ba, wb, bb, at_type="relation")
    _check("VectorsAttention[resident,bf16]", out, ref)

    # --- VectorsAttention, streamed path (forced via tile_n) with a ragged tail: N=40, tile=16 ---
    N2 = 40
    vector_s2 = jax.random.normal(kx2, (B, N2, D), dtype=jnp.float32)
    for at_type in ("self", "relation"):
        out = jax.block_until_ready(
            vectors_attention(vector_s2, wa, ba, wb, bb, at_type=at_type, tile_n=16))
        ref = vectors_attention_ref(vector_s2, wa, ba, wb, bb, at_type=at_type)
        _check(f"VectorsAttention[streamed,{at_type}]", out, ref)

    # --- FullModal_VisualFeatureAttention.liner head: ReLU -> Dropout(eval) -> Linear(128, 10) ---
    BF, FD, NC = 10, 128, 10          # BF not a multiple of 8 -> exercises the batch padding
    feature_s = jax.random.normal(kf, (BF, FD), dtype=jnp.float32)
    w = jax.random.normal(kw, (NC, FD), dtype=jnp.float32) * 0.05
    b = jax.random.normal(kb, (NC,), dtype=jnp.float32) * 0.1
    pred = jax.block_until_ready(fullmodal_liner_head(feature_s, w, b))
    _check("liner head", pred, liner_head_ref(feature_s, w, b))

    print("KERNEL_OK")
</pallas_src>

<mosaic_0001>
module attributes {stable_mosaic.version = 11 : i64} {
  func.func @_vectors_attention_resident_kernel(%arg0: i32, %arg1: memref<2x32x128xf32, #tpu.memory_space<vmem>>, %arg2: memref<128x2xf32, #tpu.memory_space<vmem>>, %arg3: memref<1x128xf32, #tpu.memory_space<vmem>>, %arg4: memref<1x2xf32, #tpu.memory_space<vmem>>, %arg5: memref<1x2x128xf32, #tpu.memory_space<vmem>>) attributes {dimension_semantics = [#tpu.dimension_semantics<parallel>], iteration_bounds = array<i64: 2>, scalar_prefetch = 0 : i64, scratch_operands = 0 : i64, tpu.core_type = #tpu.core_type<tc>, window_params = [{transform_indices = @transform_0, window_bounds = array<i64: 2, 32, 128>}, {pipeline_mode = #tpu.pipeline_mode<synchronous>, transform_indices = @transform_1, window_bounds = array<i64: 128, 2>}, {pipeline_mode = #tpu.pipeline_mode<synchronous>, transform_indices = @transform_2, window_bounds = array<i64: 1, 128>}, {pipeline_mode = #tpu.pipeline_mode<synchronous>, transform_indices = @transform_3, window_bounds = array<i64: 1, 2>}, {transform_indices = @transform_4, window_bounds = array<i64: 1, 2, 128>}]} {
    %c0 = arith.constant 0 : index
    %c0_0 = arith.constant 0 : index
    %c0_1 = arith.constant 0 : index
    %0 = vector.load %arg1[%c0, %c0_0, %c0_1] : memref<2x32x128xf32, #tpu.memory_space<vmem>>, vector<2x32x128xf32>
    %c0_2 = arith.constant 0 : index
    %c0_3 = arith.constant 0 : index
    %1 = vector.load %arg2[%c0_2, %c0_3] : memref<128x2xf32, #tpu.memory_space<vmem>>, vector<128x2xf32>
    %c0_4 = arith.constant 0 : index
    %c0_5 = arith.constant 0 : index
    %2 = vector.load %arg4[%c0_4, %c0_5] : memref<1x2xf32, #tpu.memory_space<vmem>>, vector<1x1xf32>
    "tpu.trace_start"() <{level = 10 : i32, message = "bnd,dk->bnk"}> : () -> ()
    %cst = arith.constant dense<0.000000e+00> : vector<2x32x2xf32>
    %3 = tpu.matmul %0, %1, %cst {dimension_numbers = #tpu.dot_dimension_numbers<[2], [0], [0, 1], [1], [0, 0, 0, 1, 1, 1], [], []>} : vector<2x32x128xf32>, vector<128x2xf32>, vector<2x32x2xf32> -> vector<2x32x2xf32>
    "tpu.trace_stop"() : () -> ()
    %4 = vector.extract_strided_slice %3 {offsets = [0, 0, 0], sizes = [2, 32, 1], strides = [1, 1, 1]} : vector<2x32x2xf32> to vector<2x32x1xf32>
    %5 = vector.shape_cast %2 : vector<1x1xf32> to vector<1x1x1xf32>
    %6 = vector.broadcast %5 : vector<1x1x1xf32> to vector<2x32x1xf32>
    %7 = arith.addf %4, %6 : vector<2x32x1xf32>
    %8 = arith.negf %7 : vector<2x32x1xf32>
    %9 = math.exp %8 : vector<2x32x1xf32>
    %cst_6 = arith.constant 1.000000e+00 : f32
    %10 = vector.broadcast %cst_6 : f32 to vector<2x32x1xf32>
    %11 = arith.addf %10, %9 : vector<2x32x1xf32>
    %12 = arith.divf %10, %11 : vector<2x32x1xf32>
    "tpu.trace_start"() <{level = 10 : i32, message = "bnk,bnd->bkd"}> : () -> ()
    %cst_7 = arith.constant dense<0.000000e+00> : vector<2x1x128xf32>
    %13 = tpu.matmul %12, %0, %cst_7 {dimension_numbers = #tpu.dot_dimension_numbers<[1], [1], [2], [2], [0, 0, 0, 2, 1, 2], [0], [0]>} : vector<2x32x1xf32>, vector<2x32x128xf32>, vector<2x1x128xf32> -> vector<2x1x128xf32>
    "tpu.trace_stop"() : () -> ()
    %14 = vector.shape_cast %13 : vector<2x1x128xf32> to vector<2x128xf32>
    %cst_8 = arith.constant dense<0.000000e+00> : vector<2x1xf32>
    %15 = vector.multi_reduction <add>, %12, %cst_8 [1] : vector<2x32x1xf32> to vector<2x1xf32>
    %16 = vector.broadcast %15 : vector<2x1xf32> to vector<2x128xf32>
    %17 = arith.divf %14, %16 : vector<2x128xf32>
    %c0_9 = arith.constant 0 : index
    %c0_10 = arith.constant 0 : index
    %c0_11 = arith.constant 0 : index
    %18 = vector.load %arg5[%c0_9, %c0_10, %c0_11] : memref<1x2x128xf32, #tpu.memory_space<vmem>>, vector<1x2x128xf32>
    %19 = vector.shape_cast %18 : vector<1x2x128xf32> to vector<2x128xf32>
    %20 = vector.shape_cast %17 : vector<2x128xf32> to vector<1x2x128xf32>
    tpu.vector_store %arg5[%c0_9, %c0_10, %c0_11], %20 {strides = array<i32>} : memref<1x2x128xf32, #tpu.memory_space<vmem>>, vector<1x2x128xf32>,
    return
  }
  func.func @transform_0(%arg0: i32) -> (i32, i32, i32) {
    %c0_i32 = arith.constant 0 : i32
    %c0_i32_0 = arith.constant 0 : i32
    %c0_i32_1 = arith.constant 0 : i32
    return %arg0, %c0_i32, %c0_i32_0 : i32, i32, i32
  }
  func.func @transform_1(%arg0: i32) -> (i32, i32) {
    %c0_i32 = arith.constant 0 : i32
    %c0_i32_0 = arith.constant 0 : i32
    %c0_i32_1 = arith.constant 0 : i32
    return %c0_i32, %c0_i32_0 : i32, i32
  }
  func.func @transform_2(%arg0: i32) -> (i32, i32) {
    %c0_i32 = arith.constant 0 : i32
    %c0_i32_0 = arith.constant 0 : i32
    %c0_i32_1 = arith.constant 0 : i32
    return %c0_i32, %c0_i32_0 : i32, i32
  }
  func.func @transform_3(%arg0: i32) -> (i32, i32) {
    %c0_i32 = arith.constant 0 : i32
    %c0_i32_0 = arith.constant 0 : i32
    %c0_i32_1 = arith.constant 0 : i32
    return %c0_i32, %c0_i32_0 : i32, i32
  }
  func.func @transform_4(%arg0: i32) -> (i32, i32, i32) {
    %c0_i32 = arith.constant 0 : i32
    %c0_i32_0 = arith.constant 0 : i32
    %c0_i32_1 = arith.constant 0 : i32
    return %arg0, %c0_i32, %c0_i32_0 : i32, i32, i32
  }
}

</mosaic_0001>

<bundles_post_ra>
// kernel: tpu_custom_call.1
= control target key start
LH: loop header
LB: loop body
LE: loop exit
PB: predicated region body
PF: predicated region fallthrough
CT: control target
= control target key end

     0   :  { %9 = vsyncpa [#allocation3], 0  ;;  %s1209_s0 = inlined_call_operand.vmem [shape: f32[4,32,128], index: 0, kind: input, shape index: {}]   ;;  %s1210_s1 = inlined_call_operand.vmem [shape: f32[128,2], index: 1, kind: input, shape index: {}]   ;;  %s1211_s2 = inlined_call_operand.vmem [shape: f32[1,128], index: 2, kind: input, shape index: {}]   ;;  %s1212_s3 = inlined_call_operand.vmem [shape: f32[1,2], index: 3, kind: input, shape index: {}]   ;;  %s1213_s4 = inlined_call_operand.hbm [shape: f32[2,2,128], index: 4, kind: output, shape index: {}]  }
   0x1   :  { %11 = vsyncpa [#allocation3 + $0x1], 0  ;;  %s1020_s15 = smov 0   ;;  %s1022_s16 = smov 0  }
   0x2   :  { %s1024_s17 = smov 0   ;;  %s1026_s18 = smov 0  }
   0x3 LB: > { %s1041_s2 = sadd.s32 4294967295, %s989_s18   ;;  %s725_s19 = sadd.s32 4294967294, %s989_s18   ;;  %s989_s18 = sphi %s1026_s18, %s1219_s18   ;;  %s985_s17 = sphi %s1024_s17, %s1218_s17   ;;  %s981_s16 = sphi %s1022_s16, %s1217_s16   ;;  %s977_s15 = sphi %s1020_s15, %s1216_s15  }
   0x4   : > { %s1045_s20 = sadd.s32 1, %s989_s18   ;;  %s113_s21 = sadd.s32 1, %s985_s17 }
   0x5   : > { %s110_s22 = ssub.s32 %s989_s18, %s1045_s20  ;;  %p123_p0 = scmp.ne.s32.totalorder %s985_s17, %s981_s16 }
   0x6   : > { %p111_p1 = scmp.eq.s32.totalorder %s110_s22, 0  ;;  %p124_p2 = scmp.eq.s32.totalorder %s1041_s2, 1 }
   0x7   : > { %p129_p3 = scmp.ne.s32.totalorder %s981_s16, %s977_s15  ;;  %p130_p4 = scmp.eq.s32.totalorder %s725_s19, 1 }
   0x8   : > { %s1056_s23 = scalar_select %p111_p1, %s985_s17, %s113_s21  }
   0x9   : > { %p1058_p5 = por %p124_p2, %p123_p0  ;;  %p1062_p6 = por %p130_p4, %p129_p3 }
   0xa   : > { %p728_p7 = scmp.ge.s32.totalorder %s989_s18, 1  ;;  %p167_p8 = scmp.lt.s32.totalorder %s989_s18, 3 }
   0xc   : > { %p168_p9 = pnand %p728_p7, %p167_p8 }
   0xd   : > { %s730_s30 = sshll.u32 (!%p168_p9), %s1041_s2, 1  ;;  %s191_s29 = sand.u32 (!%p168_p9), 1, %s981_s16  }
   0xe   : > { %171 = sbr.rel (%p168_p9) target bundleno = 625 (0x271), region = 36  ;;  %p195_p10 = scmp.lt.s32.totalorder (!%p168_p9), %s730_s30, 3 }
   0xf   : > { %s745_s5 = sshll.u32 (!%p168_p9), %s1041_s2, 5  ;;  %s653_s11 = scalar_lea.sflag (!%p168_p9), [#allocation3], %s191_s29 }
  0x10   : > { %s1174_s10 = scalar_lea.hbm (!%p168_p9), %s1213_s4, %s745_s5  ;;  %s994_s2 = smov (!%p168_p9), [#allocation2]  }
  0x11   : > { %s933_s13 = sshll.u32 (!%p168_p9), %s994_s2, 4  ;;  %s934_s13 = int_to_ptr.vmem [resolvable:$false] %s933_s13 }
  0x12   : > { %s935_s19 = scalar_lea.vmem (!%p168_p9), %s934_s13, 64 }
  0x13   : > { %v224_v0 = vld [vmem:[%s1210_s1 + $0x78] sm:$0xff]  ;;  %v223_v1 = vld [vmem:[%s1210_s1 + $0x70] sm:$0xff]  ;;  %v222_v2 = vld [vmem:[%s1210_s1 + $0x68] sm:$0xff]  ;;  %s1221_s30 = smov (!%p195_p10, %s730_s30), 3  ;;  %v991_v24 = vmov 0.0   ;;  %vm992_vm0 = vmmov 0  }
  0x14   : > { %783 = vmatprep.subr.mxu0 %v224_v0  ;;  %v221_v3 = vld [vmem:[%s1210_s1 + $0x60] sm:$0xff]  ;;  %s748_s9 = sshll.u32 %s1221_s30, 5  ;;  %v220_v4 = vld [vmem:[%s1210_s1 + $0x58] sm:$0xff]  ;;  %v219_v6 = vld [vmem:[%s1210_s1 + $0x50] sm:$0xff]  ;;  %827 = vmatprep.subr.mxu1 %v991_v24  ;;  %vm604_vm1 = vcmask 7168   ;;  %vm425_vm2 = vcmask 261120  }
  0x15   : > { %784 = vmatpush3.msra.mxu0 %v224_v0  ;;  %s1087_s14 = scalar_lea.vmem %s1209_s0, %s748_s9  ;;  %v218_v7 = vld [vmem:[%s1210_s1 + $0x48] sm:$0xff]  ;;  %v217_v8 = vld [vmem:[%s1210_s1 + $0x40] sm:$0xff]  ;;  %v216_v9 = vld [vmem:[%s1210_s1 + $0x38] sm:$0xff]  ;;  %835 = vmatprep.mubr.msk.f32.mxu1 %vm992_vm0, %v991_v24  ;;  %s729_s30 = sshll.u32 %s191_s29, 1  ;;  %vm648_vm3 = vcmask 1041409  }
  0x16   : > { %785 = vmatprep.subr.mxu0 %v223_v1  ;;  %v201_v5 = vld [vmem:[%s1087_s14] sm:$0xff]  ;;  %v215_v10 = vld [vmem:[%s1210_s1 + $0x30] sm:$0xff]  ;;  %v214_v11 = vld [vmem:[%s1210_s1 + $0x28] sm:$0xff]  ;;  %s193_s6 = scalar_lea.vmem [#allocation2], %s729_s30 }
  0x17   : > { %786 = vmatpush3.msra.mxu0 %v223_v1  ;;  %815 = vmatprep.mubr.f32.mxu0 %v201_v5  ;;  %v213_v12 = vld [vmem:[%s1210_s1 + $0x20] sm:$0xff]  ;;  %v212_v13 = vld [vmem:[%s1210_s1 + $0x18] sm:$0xff]  ;;  %v211_v14 = vld [vmem:[%s1210_s1 + $0x10] sm:$0xff]  ;;  %s666_s7 = sshll.u32 %s193_s6, 4  ;;  %s667_s7 = int_to_ptr.vmem [resolvable:$true] %s666_s7 }
  0x18   : > { %787 = vmatprep.subr.mxu0 %v222_v2  ;;  %v210_v15 = vld [vmem:[%s1210_s1 + $0x8] sm:$0xff]  ;;  %v209_v16 = vld [vmem:[%s1210_s1] sm:$0xff]  ;;  %v203_v18 = vld [vmem:[%s1087_s14 + $0x10] sm:$0xff]  ;;  %s929_s12 = scalar_lea.vmem %s667_s7, 32  ;;  %p936_p0 = scmp.lt.s32.totalorder %s667_s7, %s934_s13 }
  0x19   : > { %788 = vmatpush3.msra.mxu0 %v222_v2  ;;  %v202_v17 = vld [vmem:[%s1087_s14 + $0x8] sm:$0xff]  ;;  %v204_v19 = vld [vmem:[%s1087_s14 + $0x18] sm:$0xff]  ;;  %v1127_v20 = vld [vmem:[%s1087_s14 + $0x20] sm:$0xff]  ;;  %p930_p11 = scmp.ne.s32.totalorder %s667_s7, %s929_s12  ;;  %p937_p1 = scmp.lt.s32.totalorder %s935_s19, %s929_s12 }
  0x1a   : > { %789 = vmatprep.subr.mxu0 %v221_v3  ;;  %v1131_v21 = vld [vmem:[%s1087_s14 + $0x28] sm:$0xff]  ;;  %v1134_v22 = vld [vmem:[%s1087_s14 + $0x30] sm:$0xff]  ;;  %v1139_v23 = vld [vmem:[%s1087_s14 + $0x38] sm:$0xff]  ;;  %828 = vmatpush3.msra.mxu1 %v204_v19 }
  0x1b   : > { %790 = vmatpush3.msra.mxu0 %v221_v3  ;;  %829 = vmatprep.subr.mxu1 %v991_v24  ;;  %v733_v25 = vld [vmem:[%s1212_s3] ss:$0 sm:$0xff]  ;;  %p931_p12 = pnand %p930_p11, %p1058_p5  ;;  %p938_p2 = por %p937_p1, %p936_p0 }
  0x1c   : > { %791 = vmatprep.subr.mxu0 %v220_v4  ;;  %830 = vmatpush3.msra.mxu1 %v203_v18 }
  0x1d   : > { %792 = vmatpush3.msra.mxu0 %v220_v4  ;;  %831 = vmatprep.subr.mxu1 %v991_v24  ;;  %p932_p13 = pneg %p931_p12 }
  0x1e   : > { %793 = vmatprep.subr.mxu0 %v219_v6  ;;  %832 = vmatpush3.msra.mxu1 %v202_v17 }
  0x1f   : > { %794 = vmatpush3.msra.mxu0 %v219_v6  ;;  %833 = vmatprep.subr.mxu1 %v991_v24  ;;  %p939_p3 = pnand %p938_p2, %p932_p13 }
  0x20   : > { %795 = vmatprep.subr.mxu0 %v218_v7  ;;  %834 = vmatpush3.msra.mxu1 %v201_v5 }
  0x21   : > { %796 = vmatpush3.msra.mxu0 %v218_v7  ;;  %838 = vmatprep.subr.mxu1 %v991_v24 }
  0x22   : > { %797 = vmatprep.subr.mxu0 %v217_v8 }
  0x23   : > { %798 = vmatpush3.msra.mxu0 %v217_v8 }
  0x24   : > { %799 = vmatprep.subr.mxu0 %v216_v9 }
  0x25   : > { %800 = vmatpush3.msra.mxu0 %v216_v9 }
  0x26   : > { %801 = vmatprep.subr.mxu0 %v215_v10 }
  0x27   : > { %802 = vmatpush3.msra.mxu0 %v215_v10 }
  0x28   : > { %803 = vmatprep.subr.mxu0 %v214_v11 }
  0x29   : > { %804 = vmatpush3.msra.mxu0 %v214_v11 }
  0x2a   : > { %805 = vmatprep.subr.mxu0 %v213_v12 }
  0x2b   : > { %806 = vmatpush3.msra.mxu0 %v213_v12 }
  0x2c   : > { %807 = vmatprep.subr.mxu0 %v212_v13 }
  0x2d   : > { %808 = vmatpush3.msra.mxu0 %v212_v13 }
  0x2e   : > { %809 = vmatprep.subr.mxu0 %v211_v14 }
  0x2f   : > { %810 = vmatpush3.msra.mxu0 %v211_v14 }
  0x30   : > { %811 = vmatprep.subr.mxu0 %v210_v15 }
  0x31   : > { %812 = vmatpush3.msra.mxu0 %v210_v15 }
  0x32   : > { %813 = vmatprep.subr.mxu0 %v209_v16 }
  0x33   : > { %814 = vmatpush3.msra.mxu0 %v209_v16 }
  0x34   : > { %816 = vmatmul.mubr.f32.vlgmr.msra.gmra.mxu0 %v202_v17 }
  0x35   : > { %818 = vmatprep.mubr.f32.mxu0 %v203_v18 }
  0x38   : > { %819 = vmatmul.mubr.f32.gmra.mxu0 %v204_v19 }
  0x39   : > { %821 = vmatprep.mubr.f32.mxu0 %v1127_v20 }
  0x3c   : > { %822 = vmatmul.mubr.f32.gmra.mxu0 %v1131_v21 }
  0x3d   : > { %824 = vmatprep.mubr.f32.mxu0 %v1134_v22 }
  0x40   : > { %825 = vmatmul.mubr.f32.gmra.mxu0 %v1139_v23 }
  0xf4   : > { %v817_v26 = vpop.f32.mrf.mxu0 }
  0xf5   : > { %v338_v27 = vadd.f32 %v817_v26, %v733_v25 }
  0xf6   : > { %v292_v28 = vpop.f32.mrf.mxu0 }
  0xf7   : > { %v735_v29 = vmul.f32 -1.442695, %v338_v27  ;;  %v337_v30 = vadd.f32 %v733_v25, %v292_v28 }
  0xf8   : > { %v820_v31 = vpop.f32.mrf.mxu0 }
  0xf9   : > { %v734_v32 = vmul.f32 -1.442695, %v337_v30  ;;  %v340_v33 = vadd.f32 %v820_v31, %v733_v25  ;;  %893 = vpow2.f32 %v735_v29 }
  0xfa   : > { %v302_v34 = vpop.f32.mrf.mxu0 }
  0xfb   : > { %895 = vpow2.f32 %v734_v32  ;;  %v339_v35 = vadd.f32 %v733_v25, %v302_v34  ;;  %v737_v37 = vmul.f32 -1.442695, %v340_v33 }
  0xfc   : > { %v823_v36 = vpop.f32.mrf.mxu0 }
  0xfd   : > { %v736_v38 = vmul.f32 -1.442695, %v339_v35  ;;  %v342_v39 = vadd.f32 %v823_v36, %v733_v25 }
  0xfe   : > { %v312_v40 = vpop.f32.mrf.mxu0 }
  0xff   : > { %897 = vpow2.f32 %v736_v38  ;;  %v739_v41 = vmul.f32 -1.442695, %v342_v39  ;;  %v341_v42 = vadd.f32 %v733_v25, %v312_v40  ;;  %v993_v40 = vmov 0  }
 0x100   : > { %v826_v43 = vpop.f32.mrf.mxu0  ;;  %899 = vpow2.f32 %v737_v37 }
 0x101   : > { %v738_v44 = vmul.f32 -1.442695, %v341_v42  ;;  %901 = vpow2.f32 %v739_v41  ;;  %v344_v45 = vadd.f32 %v826_v43, %v733_v25 }
 0x102   : > { %v322_v46 = vpop.f32.mrf.mxu0 }
 0x103   : > { %903 = vpow2.f32 %v738_v44  ;;  %v343_v47 = vadd.f32 %v733_v25, %v322_v46  ;;  %v741_v49 = vmul.f32 -1.442695, %v344_v45 }
 0x105   : > { %v740_v48 = vmul.f32 -1.442695, %v343_v47 }
 0x106   : > { %v894_v50 = vpop.eup %893 }
 0x107   : > { %905 = vpow2.f32 %v740_v48  ;;  %v370_v53 = vadd.f32 1.0, %v894_v50 }
 0x108   : > { %v896_v51 = vpop.eup %895  ;;  %907 = vpow2.f32 %v741_v49 }
 0x109   : > { %v369_v52 = vadd.f32 1.0, %v896_v51 }
 0x10b   : > { %909 = vrcp.f32 %v369_v52 }
 0x10c   : > { %v898_v54 = vpop.eup %897  ;;  %911 = vrcp.f32 %v370_v53 }
 0x10d   : > { %v900_v55 = vpop.eup %899  ;;  %v371_v56 = vadd.f32 1.0, %v898_v54 }
 0x10e   : > { %v902_v57 = vpop.eup %901  ;;  %v372_v60 = vadd.f32 1.0, %v900_v55 }
 0x10f   : > { %913 = vrcp.f32 %v371_v56  ;;  %v374_v61 = vadd.f32 1.0, %v902_v57 }
 0x110   : > { %v904_v58 = vpop.eup %903 }
 0x111   : > { %v373_v59 = vadd.f32 1.0, %v904_v58 }
 0x113   : > { %915 = vrcp.f32 %v373_v59 }
 0x114   : > { %v906_v62 = vpop.eup %905  ;;  %917 = vrcp.f32 %v372_v60 }
 0x115   : > { %v908_v63 = vpop.eup %907  ;;  %919 = vrcp.f32 %v374_v61  ;;  %v375_v0 = vadd.f32 1.0, %v906_v62 }
 0x116   : > { %v376_v2 = vadd.f32 1.0, %v908_v63 }
 0x117   : > { %921 = vrcp.f32 %v375_v0 }
 0x118   : > { %v910_v1 = vpop.eup %909  ;;  %923 = vrcp.f32 %v376_v2 }
 0x119   : > { %393 = vxpose.xlu0.b32.start [1/4] (short) (narrow) %v910_v1, 8  ;;  %v912_v3 = vpop.eup %911  ;;  %v605_v9 = vsel %vm604_vm1, %v910_v1, 0.0 }
 0x11a   : > { %v606_v10 = vsel %vm604_vm1, %v912_v3, 0.0 }
 0x11b   : > { %v607_v13 = vadd.f32 %v606_v10, %v605_v9 }
 0x11c   : > { %v914_v4 = vpop.eup %913 }
 0x11d   : > { %394 = vxpose.xlu0.b32.cont [2/4] (short) (narrow) %v912_v3, 8  ;;  %v608_v11 = vsel %vm604_vm1, %v914_v4, 0.0 }
 0x11e   : > { %v609_v15 = vadd.f32 %v608_v11, %v607_v13 }
 0x120   : > { %v916_v5 = vpop.eup %915 }
 0x121   : > { %395 = vxpose.xlu0.b32.cont [3/4] (short) (narrow) %v914_v4, 8  ;;  %499 = vxpose.xlu1.b32.start [1/4] (short) (narrow) %v916_v5, 8  ;;  %v918_v6 = vpop.eup %917  ;;  %v618_v14 = vsel %vm604_vm1, %v916_v5, 0.0 }
 0x122   : > { %v920_v7 = vpop.eup %919  ;;  %v610_v19 = vsel %vm604_vm1, %v918_v6, 0.0 }
 0x123   : > { %v619_v16 = vsel %vm604_vm1, %v920_v7, 0.0  ;;  %v611_v26 = vadd.f32 %v610_v19, %v609_v15 }
 0x124   : > { %v922_v8 = vpop.eup %921  ;;  %v620_v18 = vadd.f32 %v619_v16, %v618_v14 }
 0x125   : > { %396 = vxpose.xlu0.b32.end [4/4] (short) (narrow) %v918_v6, 8  ;;  %500 = vxpose.xlu1.b32.cont [2/4] (short) (narrow) %v920_v7, 8  ;;  %v924_v12 = vpop.eup %923  ;;  %v621_v17 = vsel %vm604_vm1, %v922_v8, 0.0  ;;  %v612_v29 = vrot.slane %v611_v26, 4 }
 0x126   : > { %v622_v25 = vadd.f32 %v621_v17, %v620_v18  ;;  %v623_v27 = vsel %vm604_vm1, %v924_v12, 0.0 }
 0x127   : > { %v613_v31 = vadd.f32 %v612_v29, %v611_v26 }
 0x128   : > { %v624_v28 = vadd.f32 %v623_v27, %v622_v25 }
 0x129   : > { %501 = vxpose.xlu1.b32.cont [3/4] (short) (narrow) %v922_v8, 8  ;;  %v614_v33 = vrot.slane %v613_v31, 2 }
 0x12a   : > { %v625_v30 = vrot.slane %v624_v28, 4 }
 0x12b   : > { %v615_v35 = vadd.f32 %v614_v33, %v613_v31 }
 0x12c   : > { %v626_v32 = vadd.f32 %v625_v30, %v624_v28 }
 0x12d   : > { %502 = vxpose.xlu1.b32.end [4/4] (short) (narrow) %v924_v12, 8  ;;  %v616_v37 = vrot.slane %v615_v35, 1 }
 0x12e   : > { %v627_v34 = vrot.slane %v626_v32, 2 }
 0x12f   : > { %v617_v39 = vadd.f32 %v616_v37, %v615_v35 }
 0x130   : > { %v628_v36 = vadd.f32 %v627_v34, %v626_v32 }
 0x132   : > { %v629_v38 = vrot.slane %v628_v36, 1 }
 0x134   : > { %v630_v41 = vadd.f32 %v629_v38, %v628_v36 }
 0x14b   : > { %892 = vset.pattern.permute.xlu1 %v993_v40 }
 0x14c   : > { %633 = vperm.xlu1 %892, %v617_v39  }
 0x14e   : > { %891 = vset.pattern.permute.xlu0 %v993_v40 }
 0x14f   : > { %638 = vperm.xlu0 %891, %v630_v41  }
 0x195   : > { %v409_v42 = vpop.trf.xlu0 }
 0x196   : > { %836 = vmatmul.mubr.msk.f32.vlgmr.msra.gmra.mxu1 %vm425_vm2, %v409_v42 }
 0x197   : > { %839 = vmatpush3.msra.mxu1 %v1139_v23  ;;  %846 = vmatprep.mubr.msk.f32.mxu1 %vm992_vm0, %v991_v24 }
 0x198   : > { %840 = vmatprep.subr.mxu1 %v991_v24 }
 0x199   : > { %841 = vmatpush3.msra.mxu1 %v1134_v22 }
 0x19a   : > { %842 = vmatprep.subr.mxu1 %v991_v24 }
 0x19b   : > { %843 = vmatpush3.msra.mxu1 %v1131_v21 }
 0x19c   : > { %844 = vmatprep.subr.mxu1 %v991_v24 }
 0x19d   : > { %845 = vmatpush3.msra.mxu1 %v1127_v20  ;;  %v515_v43 = vpop.trf.xlu1 }
 0x19e   : > { %847 = vmatmul.mubr.msk.f32.vlgmr.msra.gmra.mxu1 %vm425_vm2, %v515_v43 }
 0x1c7   : > { %v634_v23 = vpop.permute.xlu1 %633 }
 0x1ca   : > { %v639_v44 = vpop.permute.xlu0 %638 }
 0x1cb   : > { %925 = vrcp.f32 %v639_v44 }
 0x1cc   : > { %927 = vrcp.f32 %v634_v23 }
 0x1d8   : > { %v926_v22 = vpop.eup %925 }
 0x1d9   : > { %v928_v21 = vpop.eup %927 }
 0x256   : > { %v495_v45 = vpop.f32.mrf.mxu1 }
 0x257   : > { %v642_v20 = vmul.f32 %v928_v21, %v495_v45 }
 0x258   : > { %v837_v46 = vpop.f32.mrf.mxu1 }
 0x25e   : > { %v600_v47 = vpop.f32.mrf.mxu1 }
 0x25f   : > { %v644_v48 = vmul.f32 %v926_v22, %v600_v47 }
 0x260   : > { %v848_v24 = vpop.f32.mrf.mxu1 }
 0x261   : > { %v647_v49 = vrot.slane %v644_v48, 7 }
 0x263   : > { %v649_v50 = vsel %vm648_vm3, %v647_v49, %v642_v20 }
 0x264   : > { %651 = vst [vmem:[%s193_s6] sm:$0x3] %v649_v50 }
 0x265   : > { %942 = shalt.err (!%p939_p3)
}
 0x266   : > { %s943_s21 = scalar_lea.hbm %s1174_s10, 32  ;;  %s947_s27 = scalar_lea.hbm %s1213_s4, 64 }
 0x267   : > { %p944_p4 = scmp.ne.s32.totalorder %s1174_s10, %s943_s21  ;;  %p948_p9 = scmp.lt.s32.totalorder %s1174_s10, %s1213_s4 }
 0x268   : > { %p949_p10 = scmp.lt.s32.totalorder %s947_s27, %s943_s21 }
 0x269   : > { %p945_p7 = pnand %p944_p4, %p1058_p5 }
 0x26a   : > { %p950_p11 = por %p949_p10, %p948_p9 }
 0x26b   : > { %p946_p8 = pneg %p945_p7 }
 0x26d   : > { %p951_p12 = pnand %p950_p11, %p946_p8 }
 0x26f   : > { %954 = shalt.err (!%p951_p12)
}
 0x270   : > { %849 = dma.vmem_to_hbm [thread:$0]  (%p1058_p5), %s667_s7, 32, %s1174_s10, %s653_s11  }
 0x271 PF: > { %p855_p13 = scmp.ge.s32.totalorder %s989_s18, 2  ;;  %s678_s29 = sand.u32 1, %s977_s15  }
 0x272   : > { %s679_s30 = scalar_lea.sflag [#allocation3], %s678_s29 }
 0x273   : > { %p852_p0 = pnand %p855_p13, %p1062_p6 }
 0x275   : > { %p853_p1 = pneg %p852_p0 }
 0x277   : > { %972 = dma.done.wait (%p853_p1), %s679_s30, 32  }
 0x278   : > { %974 = vsyncadd (%p853_p1), %s679_s30, 4294967264  ;;  %p14_p2 = scmp.ge.s32.totalorder %s1045_s20, 4   ;;  %s1216_s15 = smov %s981_s16 }
 0x279   : > { %s1217_s16 = smov %s985_s17  ;;  %s1218_s17 = smov %s1056_s23 }
 0x27a   : > { %s1219_s18 = smov %s1045_s20  ;;  %16 = sbr.rel (!%p14_p2) target bundleno = 3 (0x3), region = 71 }
 0x27f   :  { %684 = vsyncpa [#allocation3], 1 }
 0x280   :  { %686 = vsyncpa [#allocation3 + $0x1], 1 }

</bundles_post_ra>
